<compile_context>
chip_gen: v5e
topology: v5e:2x2
jax: 0.10.0
libtpu: 0.0.40
codegen_flags: <defaults>
</compile_context>

<pallas_src>
import math

import jax
import jax.numpy as jnp
from jax.experimental import pallas as pl
from jax.experimental.pallas import tpu as pltpu


def linear_kernel(x_ref, w_ref, b_ref, o_ref):
    # x_ref: (TM, D_in)   tile of input rows
    # w_ref: (H_pad, D_in) torch-layout weight (resident across the grid)
    # b_ref: (1, H_pad)    bias
    # o_ref: (TM, H_pad)   output tile (lane-dense: H_pad % 128 == 0 or full)
    acc = jax.lax.dot_general(
        x_ref[...],
        w_ref[...],
        dimension_numbers=(((1,), (1,)), ((), ())),  # contract D_in of both
        preferred_element_type=jnp.float32,
    )
    o_ref[...] = (acc + b_ref[...]).astype(o_ref.dtype)


def linear_layer(x, weight, bias, *, max_tile_rows=512):
    """x: (..., D_in); weight: (H, D_in) torch-style; bias: (H,).
    Returns (..., H)."""
    orig_shape = x.shape
    d_in = orig_shape[-1]
    h = weight.shape[0]
    m = math.prod(orig_shape[:-1]) if len(orig_shape) > 1 else 1

    x2 = x.reshape(m, d_in)

    # Lane-dense output: pad H up to a multiple of 128 (no-op if already dense).
    h_pad = ((h + 127) // 128) * 128
    if h_pad != h:
        weight = jnp.pad(weight, ((0, h_pad - h), (0, 0)))
        bias = jnp.pad(bias, (0, h_pad - h))
    b2d = bias.reshape(1, h_pad)

    # Row tile: whole thing if it fits, otherwise 512-row tiles (multiple of 8).
    if m <= max_tile_rows:
        tm = m  # block == full dim -> always a legal block shape
    else:
        tm = max_tile_rows
    grid = (pl.cdiv(m, tm),)

    # Explicit VMEM budget (double-buffered x/out tiles + resident weight/bias),
    # clamped so it is safe on v7x's 64 MiB VMEM.
    elt = jnp.dtype(x.dtype).itemsize
    welt = jnp.dtype(weight.dtype).itemsize
    need = (
        2 * (tm * d_in + tm * h_pad) * elt      # x tile + out tile, double-buffered
        + 2 * (h_pad * d_in + h_pad) * welt     # weight + bias
        + tm * h_pad * 4                        # f32 matmul accumulator
    )
    vmem_limit = int(min(max(2 * need, 16 * 1024 * 1024), 48 * 1024 * 1024))

    out2 = pl.pallas_call(
        linear_kernel,
        out_shape=jax.ShapeDtypeStruct((m, h_pad), x.dtype),
        grid_spec=pltpu.PrefetchScalarGridSpec(
            num_scalar_prefetch=0,
            grid=grid,
            in_specs=[
                pl.BlockSpec((tm, d_in), lambda i: (i, 0)),      # x row tile
                pl.BlockSpec((h_pad, d_in), lambda i: (0, 0)),   # weight (resident)
                pl.BlockSpec((1, h_pad), lambda i: (0, 0)),      # bias (resident)
            ],
            out_specs=pl.BlockSpec((tm, h_pad), lambda i: (i, 0)),
        ),
        compiler_params=pltpu.CompilerParams(
            dimension_semantics=("parallel",),
            vmem_limit_bytes=vmem_limit,
        ),
    )(x2, weight, b2d)

    out = out2[:, :h] if h_pad != h else out2
    return out.reshape(*orig_shape[:-1], h)


if __name__ == "__main__":
    # Small shapes consistent with the module: batch=2, seq=64, input_dim=16,
    # hidden_dim=32.
    B, N, D_in, H = 2, 64, 16, 32

    key = jax.random.PRNGKey(0)
    kx, kw, kb = jax.random.split(key, 3)

    # PyTorch Linear default init: U(-1/sqrt(in), 1/sqrt(in)).
    bound = 1.0 / math.sqrt(D_in)
    weight = jax.random.uniform(kw, (H, D_in), jnp.float32, -bound, bound)
    bias = jax.random.uniform(kb, (H,), jnp.float32, -bound, bound)

    x = jax.random.normal(kx, (B, N, D_in), jnp.float32)

    out = linear_layer(x, weight, bias)
    out = jax.block_until_ready(out)

    # Pure-JAX reference.
    ref = jnp.einsum("bnd,hd->bnh", x, weight) + bias
    assert out.shape == (B, N, H), out.shape
    assert jnp.allclose(out, ref, atol=1e-5, rtol=1e-5), "mismatch vs reference"

    print("KERNEL_OK")
</pallas_src>

<mosaic_0001>
module attributes {stable_mosaic.version = 11 : i64} {
  func.func @linear_kernel(%arg0: i32, %arg1: memref<128x16xf32, #tpu.memory_space<vmem>>, %arg2: memref<128x16xf32, #tpu.memory_space<vmem>>, %arg3: memref<1x128xf32, #tpu.memory_space<vmem>>, %arg4: memref<128x128xf32, #tpu.memory_space<vmem>>) attributes {dimension_semantics = [#tpu.dimension_semantics<parallel>], iteration_bounds = array<i64: 1>, scalar_prefetch = 0 : i64, scratch_operands = 0 : i64, tpu.core_type = #tpu.core_type<tc>, window_params = [{transform_indices = @transform_0, window_bounds = array<i64: 128, 16>}, {pipeline_mode = #tpu.pipeline_mode<synchronous>, transform_indices = @transform_1, window_bounds = array<i64: 128, 16>}, {pipeline_mode = #tpu.pipeline_mode<synchronous>, transform_indices = @transform_2, window_bounds = array<i64: 1, 128>}, {transform_indices = @transform_3, window_bounds = array<i64: 128, 128>}]} {
    %c0 = arith.constant 0 : index
    %c0_0 = arith.constant 0 : index
    %0 = vector.load %arg1[%c0, %c0_0] : memref<128x16xf32, #tpu.memory_space<vmem>>, vector<128x16xf32>
    %c0_1 = arith.constant 0 : index
    %c0_2 = arith.constant 0 : index
    %1 = vector.load %arg2[%c0_1, %c0_2] : memref<128x16xf32, #tpu.memory_space<vmem>>, vector<128x16xf32>
    %cst = arith.constant dense<0.000000e+00> : vector<128x128xf32>
    %2 = tpu.matmul %0, %1, %cst {dimension_numbers = #tpu.dot_dimension_numbers<[1], [1], [0], [0], [0, 0, 1, 0], [], []>} : vector<128x16xf32>, vector<128x16xf32>, vector<128x128xf32> -> vector<128x128xf32>
    %c0_3 = arith.constant 0 : index
    %c0_4 = arith.constant 0 : index
    %3 = vector.load %arg3[%c0_3, %c0_4] : memref<1x128xf32, #tpu.memory_space<vmem>>, vector<1x128xf32>
    %4 = vector.broadcast %3 : vector<1x128xf32> to vector<128x128xf32>
    %5 = arith.addf %2, %4 : vector<128x128xf32>
    %c0_5 = arith.constant 0 : index
    %c0_6 = arith.constant 0 : index
    %6 = vector.load %arg4[%c0_5, %c0_6] : memref<128x128xf32, #tpu.memory_space<vmem>>, vector<128x128xf32>
    tpu.vector_store %arg4[%c0_5, %c0_6], %5 {strides = array<i32>} : memref<128x128xf32, #tpu.memory_space<vmem>>, vector<128x128xf32>,
    return
  }
  func.func @transform_0(%arg0: i32) -> (i32, i32) {
    %c0_i32 = arith.constant 0 : i32
    %c0_i32_0 = arith.constant 0 : i32
    return %arg0, %c0_i32 : i32, i32
  }
  func.func @transform_1(%arg0: i32) -> (i32, i32) {
    %c0_i32 = arith.constant 0 : i32
    %c0_i32_0 = arith.constant 0 : i32
    %c0_i32_1 = arith.constant 0 : i32
    return %c0_i32, %c0_i32_0 : i32, i32
  }
  func.func @transform_2(%arg0: i32) -> (i32, i32) {
    %c0_i32 = arith.constant 0 : i32
    %c0_i32_0 = arith.constant 0 : i32
    %c0_i32_1 = arith.constant 0 : i32
    return %c0_i32, %c0_i32_0 : i32, i32
  }
  func.func @transform_3(%arg0: i32) -> (i32, i32) {
    %c0_i32 = arith.constant 0 : i32
    %c0_i32_0 = arith.constant 0 : i32
    return %arg0, %c0_i32 : i32, i32
  }
}

</mosaic_0001>

<bundles_post_ra>
// kernel: tpu_custom_call.1
= control target key start
LH: loop header
LB: loop body
LE: loop exit
PB: predicated region body
PF: predicated region fallthrough
CT: control target
= control target key end

     0   :  { %vm51_vm0 = vcmask 130048   ;;  %s562_s0 = inlined_call_operand.vmem [shape: f32[128,16], index: 0, kind: input, shape index: {}]   ;;  %s563_s1 = inlined_call_operand.vmem [shape: f32[128,16], index: 1, kind: input, shape index: {}]   ;;  %s564_s2 = inlined_call_operand.vmem [shape: f32[1,128], index: 2, kind: input, shape index: {}]   ;;  %s565_s3 = inlined_call_operand.hbm [shape: f32[128,128], index: 3, kind: output, shape index: {}]  }
   0x1   :  { %v46_v0 = vld [vmem:[%s563_s1 + $0x78] sm:$0xff]  ;;  %v45_v1 = vld [vmem:[%s563_s1 + $0x70] sm:$0xff] }
   0x2   :  { %280 = vmatpush.xpose.msk.msra.mxu2 %vm51_vm0, %v46_v0  ;;  %281 = vmatpush.xpose.msk.msra.mxu3 %vm51_vm0, %v46_v0 }
   0x3   :  { %247 = vmatpush.xpose.msk.msra.mxu0 %vm51_vm0, %v46_v0  ;;  %279 = vmatpush.xpose.msk.msra.mxu1 %vm51_vm0, %v46_v0 }
   0x4   :  { %8 = vsyncpa [#allocation3], 0  ;;  %v44_v2 = vld [vmem:[%s563_s1 + $0x68] sm:$0xff]  ;;  %v43_v3 = vld [vmem:[%s563_s1 + $0x60] sm:$0xff]  ;;  %s235_s24 = sshll.u32 %s565_s3, 4  ;;  %s358_s25 = smov 128   ;;  %s236_s24 = int_to_ptr.hbm [resolvable:$true] %s235_s24 }
   0x5   :  { %v42_v4 = vld [vmem:[%s563_s1 + $0x58] sm:$0xff]  ;;  %v41_v5 = vld [vmem:[%s563_s1 + $0x50] sm:$0xff]  ;;  %v40_v6 = vld [vmem:[%s563_s1 + $0x48] sm:$0xff]  ;;  %s359_s26 = smov 8  }
   0x6   :  { %283 = vmatpush.xpose.msk.msra.mxu2 %vm51_vm0, %v45_v1  ;;  %284 = vmatpush.xpose.msk.msra.mxu3 %vm51_vm0, %v45_v1  ;;  %v39_v7 = vld [vmem:[%s563_s1 + $0x40] sm:$0xff]  ;;  %v38_v8 = vld [vmem:[%s563_s1 + $0x38] sm:$0xff]  ;;  %v37_v9 = vld [vmem:[%s563_s1 + $0x30] sm:$0xff] }
   0x7   :  { %248 = vmatpush.xpose.msk.msra.mxu0 %vm51_vm0, %v45_v1  ;;  %282 = vmatpush.xpose.msk.msra.mxu1 %vm51_vm0, %v45_v1  ;;  %v36_v10 = vld [vmem:[%s563_s1 + $0x28] sm:$0xff]  ;;  %v35_v11 = vld [vmem:[%s563_s1 + $0x20] sm:$0xff]  ;;  %v34_v12 = vld [vmem:[%s563_s1 + $0x18] sm:$0xff] }
   0x8   :  { %v33_v13 = vld [vmem:[%s563_s1 + $0x10] sm:$0xff]  ;;  %v32_v14 = vld [vmem:[%s563_s1 + $0x8] sm:$0xff]  ;;  %v31_v15 = vld [vmem:[%s563_s1] sm:$0xff] }
   0x9   :  { %v23_v16 = vld [vmem:[%s562_s0 + $0x40] sm:$0xff]  ;;  %v24_v20 = vld [vmem:[%s562_s0 + $0x48] sm:$0xff]  ;;  %v25_v24 = vld [vmem:[%s562_s0 + $0x50] sm:$0xff] }
   0xa   :  { %286 = vmatpush.xpose.msk.msra.mxu2 %vm51_vm0, %v44_v2  ;;  %287 = vmatpush.xpose.msk.msra.mxu3 %vm51_vm0, %v44_v2  ;;  %v27_v17 = vld [vmem:[%s562_s0 + $0x60] sm:$0xff]  ;;  %v28_v21 = vld [vmem:[%s562_s0 + $0x68] sm:$0xff]  ;;  %v29_v25 = vld [vmem:[%s562_s0 + $0x70] sm:$0xff] }
   0xb   :  { %249 = vmatpush.xpose.msk.msra.mxu0 %vm51_vm0, %v44_v2  ;;  %285 = vmatpush.xpose.msk.msra.mxu1 %vm51_vm0, %v44_v2  ;;  %v15_v18 = vld [vmem:[%s562_s0] sm:$0xff]  ;;  %v16_v22 = vld [vmem:[%s562_s0 + $0x8] sm:$0xff]  ;;  %v17_v26 = vld [vmem:[%s562_s0 + $0x10] sm:$0xff] }
   0xc   :  { %v19_v19 = vld [vmem:[%s562_s0 + $0x20] sm:$0xff]  ;;  %v20_v23 = vld [vmem:[%s562_s0 + $0x28] sm:$0xff]  ;;  %v21_v27 = vld [vmem:[%s562_s0 + $0x30] sm:$0xff] }
   0xd   :  { %v26_v28 = vld [vmem:[%s562_s0 + $0x58] sm:$0xff]  ;;  %v330_v32 = vld [vmem:[%s564_s2] ss:$0 sm:$0xff] }
   0xe   :  { %289 = vmatpush.xpose.msk.msra.mxu2 %vm51_vm0, %v43_v3  ;;  %290 = vmatpush.xpose.msk.msra.mxu3 %vm51_vm0, %v43_v3  ;;  %v30_v29 = vld [vmem:[%s562_s0 + $0x78] sm:$0xff] }
   0xf   :  { %250 = vmatpush.xpose.msk.msra.mxu0 %vm51_vm0, %v43_v3  ;;  %288 = vmatpush.xpose.msk.msra.mxu1 %vm51_vm0, %v43_v3  ;;  %v18_v30 = vld [vmem:[%s562_s0 + $0x18] sm:$0xff] }
  0x10   :  { %v22_v31 = vld [vmem:[%s562_s0 + $0x38] sm:$0xff]  ;;  %s357_s0 = smov [#allocation2]  }
  0x11   :  { %s233_s2 = sshll.u32 %s357_s0, 4  ;;  %s234_s2 = int_to_ptr.vmem [resolvable:$true] %s233_s2 }
  0x12   :  { %292 = vmatpush.xpose.msk.msra.mxu2 %vm51_vm0, %v42_v4  ;;  %293 = vmatpush.xpose.msk.msra.mxu3 %vm51_vm0, %v42_v4 }
  0x13   :  { %251 = vmatpush.xpose.msk.msra.mxu0 %vm51_vm0, %v42_v4  ;;  %291 = vmatpush.xpose.msk.msra.mxu1 %vm51_vm0, %v42_v4 }
  0x16   :  { %295 = vmatpush.xpose.msk.msra.mxu2 %vm51_vm0, %v41_v5  ;;  %296 = vmatpush.xpose.msk.msra.mxu3 %vm51_vm0, %v41_v5 }
  0x17   :  { %252 = vmatpush.xpose.msk.msra.mxu0 %vm51_vm0, %v41_v5  ;;  %294 = vmatpush.xpose.msk.msra.mxu1 %vm51_vm0, %v41_v5 }
  0x1a   :  { %298 = vmatpush.xpose.msk.msra.mxu2 %vm51_vm0, %v40_v6  ;;  %299 = vmatpush.xpose.msk.msra.mxu3 %vm51_vm0, %v40_v6 }
  0x1b   :  { %253 = vmatpush.xpose.msk.msra.mxu0 %vm51_vm0, %v40_v6  ;;  %297 = vmatpush.xpose.msk.msra.mxu1 %vm51_vm0, %v40_v6 }
  0x1e   :  { %301 = vmatpush.xpose.msk.msra.mxu2 %vm51_vm0, %v39_v7  ;;  %302 = vmatpush.xpose.msk.msra.mxu3 %vm51_vm0, %v39_v7 }
  0x1f   :  { %254 = vmatpush.xpose.msk.msra.mxu0 %vm51_vm0, %v39_v7  ;;  %300 = vmatpush.xpose.msk.msra.mxu1 %vm51_vm0, %v39_v7 }
  0x22   :  { %304 = vmatpush.xpose.msk.msra.mxu2 %vm51_vm0, %v38_v8  ;;  %305 = vmatpush.xpose.msk.msra.mxu3 %vm51_vm0, %v38_v8 }
  0x23   :  { %255 = vmatpush.xpose.msk.msra.mxu0 %vm51_vm0, %v38_v8  ;;  %303 = vmatpush.xpose.msk.msra.mxu1 %vm51_vm0, %v38_v8 }
  0x26   :  { %307 = vmatpush.xpose.msk.msra.mxu2 %vm51_vm0, %v37_v9  ;;  %308 = vmatpush.xpose.msk.msra.mxu3 %vm51_vm0, %v37_v9 }
  0x27   :  { %256 = vmatpush.xpose.msk.msra.mxu0 %vm51_vm0, %v37_v9  ;;  %306 = vmatpush.xpose.msk.msra.mxu1 %vm51_vm0, %v37_v9 }
  0x2a   :  { %310 = vmatpush.xpose.msk.msra.mxu2 %vm51_vm0, %v36_v10  ;;  %311 = vmatpush.xpose.msk.msra.mxu3 %vm51_vm0, %v36_v10 }
  0x2b   :  { %257 = vmatpush.xpose.msk.msra.mxu0 %vm51_vm0, %v36_v10  ;;  %309 = vmatpush.xpose.msk.msra.mxu1 %vm51_vm0, %v36_v10 }
  0x2e   :  { %313 = vmatpush.xpose.msk.msra.mxu2 %vm51_vm0, %v35_v11  ;;  %314 = vmatpush.xpose.msk.msra.mxu3 %vm51_vm0, %v35_v11 }
  0x2f   :  { %258 = vmatpush.xpose.msk.msra.mxu0 %vm51_vm0, %v35_v11  ;;  %312 = vmatpush.xpose.msk.msra.mxu1 %vm51_vm0, %v35_v11 }
  0x32   :  { %316 = vmatpush.xpose.msk.msra.mxu2 %vm51_vm0, %v34_v12  ;;  %317 = vmatpush.xpose.msk.msra.mxu3 %vm51_vm0, %v34_v12 }
  0x33   :  { %259 = vmatpush.xpose.msk.msra.mxu0 %vm51_vm0, %v34_v12  ;;  %315 = vmatpush.xpose.msk.msra.mxu1 %vm51_vm0, %v34_v12 }
  0x36   :  { %319 = vmatpush.xpose.msk.msra.mxu2 %vm51_vm0, %v33_v13  ;;  %320 = vmatpush.xpose.msk.msra.mxu3 %vm51_vm0, %v33_v13 }
  0x37   :  { %260 = vmatpush.xpose.msk.msra.mxu0 %vm51_vm0, %v33_v13  ;;  %318 = vmatpush.xpose.msk.msra.mxu1 %vm51_vm0, %v33_v13 }
  0x3a   :  { %322 = vmatpush.xpose.msk.msra.mxu2 %vm51_vm0, %v32_v14  ;;  %323 = vmatpush.xpose.msk.msra.mxu3 %vm51_vm0, %v32_v14 }
  0x3b   :  { %261 = vmatpush.xpose.msk.msra.mxu0 %vm51_vm0, %v32_v14  ;;  %321 = vmatpush.xpose.msk.msra.mxu1 %vm51_vm0, %v32_v14 }
  0x3e   :  { %325 = vmatpush.xpose.msk.msra.mxu2 %vm51_vm0, %v31_v15  ;;  %326 = vmatpush.xpose.msk.msra.mxu3 %vm51_vm0, %v31_v15 }
  0x3f   :  { %262 = vmatpush.xpose.msk.msra.mxu0 %vm51_vm0, %v31_v15  ;;  %324 = vmatpush.xpose.msk.msra.mxu1 %vm51_vm0, %v31_v15 }
  0x41   :  { %271 = vmatmul.msk.f32.vlgmr.msra.gmra.mxu2 %vm51_vm0, %v23_v16  ;;  %275 = vmatmul.msk.f32.vlgmr.msra.gmra.mxu3 %vm51_vm0, %v27_v17 }
  0x42   :  { %263 = vmatmul.msk.f32.vlgmr.msra.gmra.mxu0 %vm51_vm0, %v15_v18  ;;  %267 = vmatmul.msk.f32.vlgmr.msra.gmra.mxu1 %vm51_vm0, %v19_v19 }
  0x49   :  { %272 = vmatmul.msk.f32.gmra.mxu2 %vm51_vm0, %v24_v20  ;;  %276 = vmatmul.msk.f32.gmra.mxu3 %vm51_vm0, %v28_v21 }
  0x4a   :  { %264 = vmatmul.msk.f32.gmra.mxu0 %vm51_vm0, %v16_v22  ;;  %268 = vmatmul.msk.f32.gmra.mxu1 %vm51_vm0, %v20_v23 }
  0x51   :  { %273 = vmatmul.msk.f32.gmra.mxu2 %vm51_vm0, %v25_v24  ;;  %277 = vmatmul.msk.f32.gmra.mxu3 %vm51_vm0, %v29_v25 }
  0x52   :  { %265 = vmatmul.msk.f32.gmra.mxu0 %vm51_vm0, %v17_v26  ;;  %269 = vmatmul.msk.f32.gmra.mxu1 %vm51_vm0, %v21_v27 }
  0x59   :  { %274 = vmatmul.msk.f32.gmra.mxu2 %vm51_vm0, %v26_v28  ;;  %278 = vmatmul.msk.f32.gmra.mxu3 %vm51_vm0, %v30_v29 }
  0x5a   :  { %266 = vmatmul.msk.f32.gmra.mxu0 %vm51_vm0, %v18_v30  ;;  %270 = vmatmul.msk.f32.gmra.mxu1 %vm51_vm0, %v22_v31 }
  0xbf   :  { %v165_v33 = vpop.f32.mrf.mxu0  ;;  %v177_v34 = vpop.f32.mrf.mxu1 }
  0xc0   :  { %v166_v35 = vadd.f32 %v330_v32, %v165_v33  ;;  %v178_v36 = vadd.f32 %v330_v32, %v177_v34 }
  0xc2   :  { %213 = vst [vmem:[#allocation2] sm:$0xff] %v166_v35 }
  0xc3   :  { %217 = vst [vmem:[#allocation2 + $0x20] sm:$0xff] %v178_v36 }
  0xc4   :  { %v189_v37 = vpop.f32.mrf.mxu2  ;;  %v201_v38 = vpop.f32.mrf.mxu3 }
  0xc5   :  { %v190_v39 = vadd.f32 %v330_v32, %v189_v37  ;;  %v202_v40 = vadd.f32 %v330_v32, %v201_v38 }
  0xc7   :  { %221 = vst [vmem:[#allocation2 + $0x40] sm:$0xff] %v190_v39  ;;  %v168_v41 = vpop.f32.mrf.mxu0  ;;  %v180_v42 = vpop.f32.mrf.mxu1 }
  0xc8   :  { %225 = vst [vmem:[#allocation2 + $0x60] sm:$0xff] %v202_v40  ;;  %v169_v43 = vadd.f32 %v330_v32, %v168_v41  ;;  %v181_v44 = vadd.f32 %v330_v32, %v180_v42 }
  0xca   :  { %214 = vst [vmem:[#allocation2 + $0x8] sm:$0xff] %v169_v43 }
  0xcb   :  { %218 = vst [vmem:[#allocation2 + $0x28] sm:$0xff] %v181_v44 }
  0xcc   :  { %v192_v45 = vpop.f32.mrf.mxu2  ;;  %v204_v46 = vpop.f32.mrf.mxu3 }
  0xcd   :  { %v193_v47 = vadd.f32 %v330_v32, %v192_v45  ;;  %v205_v48 = vadd.f32 %v330_v32, %v204_v46 }
  0xcf   :  { %222 = vst [vmem:[#allocation2 + $0x48] sm:$0xff] %v193_v47  ;;  %v171_v49 = vpop.f32.mrf.mxu0  ;;  %v183_v50 = vpop.f32.mrf.mxu1 }
  0xd0   :  { %226 = vst [vmem:[#allocation2 + $0x68] sm:$0xff] %v205_v48  ;;  %v172_v51 = vadd.f32 %v330_v32, %v171_v49  ;;  %v184_v52 = vadd.f32 %v330_v32, %v183_v50 }
  0xd2   :  { %215 = vst [vmem:[#allocation2 + $0x10] sm:$0xff] %v172_v51 }
  0xd3   :  { %219 = vst [vmem:[#allocation2 + $0x30] sm:$0xff] %v184_v52 }
  0xd4   :  { %v195_v53 = vpop.f32.mrf.mxu2  ;;  %v207_v54 = vpop.f32.mrf.mxu3 }
  0xd5   :  { %v196_v55 = vadd.f32 %v330_v32, %v195_v53  ;;  %v208_v56 = vadd.f32 %v330_v32, %v207_v54 }
  0xd7   :  { %223 = vst [vmem:[#allocation2 + $0x50] sm:$0xff] %v196_v55  ;;  %v174_v57 = vpop.f32.mrf.mxu0  ;;  %v186_v58 = vpop.f32.mrf.mxu1 }
  0xd8   :  { %227 = vst [vmem:[#allocation2 + $0x70] sm:$0xff] %v208_v56  ;;  %v175_v59 = vadd.f32 %v330_v32, %v174_v57  ;;  %v187_v60 = vadd.f32 %v330_v32, %v186_v58 }
  0xda   :  { %216 = vst [vmem:[#allocation2 + $0x18] sm:$0xff] %v175_v59 }
  0xdb   :  { %220 = vst [vmem:[#allocation2 + $0x38] sm:$0xff] %v187_v60 }
  0xdc   :  { %v198_v61 = vpop.f32.mrf.mxu2  ;;  %v210_v62 = vpop.f32.mrf.mxu3 }
  0xdd   :  { %v199_v63 = vadd.f32 %v330_v32, %v198_v61  ;;  %v211_v0 = vadd.f32 %v330_v32, %v210_v62 }
  0xdf   :  { %224 = vst [vmem:[#allocation2 + $0x58] sm:$0xff] %v199_v63 }
  0xe0   :  { %228 = vst [vmem:[#allocation2 + $0x78] sm:$0xff] %v211_v0 }
  0xe1   :  { %241 = dma.vmem_to_hbm [thread:$0]  %s234_s2, 2048, %s236_s24, [#allocation3], %s358_s25, %s358_s25, %s359_s26  }
  0xe2   :  { %355 = dma.done.wait [#allocation3], 2048  }
  0xe3   :  { %356 = vsyncadd [#allocation3], 4294965248 }
  0xe4   :  { %246 = vsyncpa [#allocation3], 1 }

</bundles_post_ra>
